<compile_context>
chip_gen: v6e
topology: v6e:2x2x1
jax: 0.10.0
libtpu: 0.0.40
codegen_flags: <defaults>
</compile_context>

<pallas_src>
import functools

import jax
import jax.numpy as jnp
from jax import lax
from jax.experimental import pallas as pl
from jax.experimental.pallas import tpu as pltpu

HIDDEN = 256
LANES = 128      # lane width to pad the class dim to (lane-dense output stores)
SUB = 128        # sub-tile rows: h=[128,256] f32 = 32 vregs -> no register spills
MAX_TM = 2048    # upper bound on batch rows per grid step (a few MiB of VMEM)


def _round_up(x, m):
    return (x + m - 1) // m * m


def _pick_tm(b_pad, sub, max_tm):
    """Largest tile (multiple of `sub`, divisor of b_pad, <= max_tm) that still
    leaves >=2 grid steps when possible (megacore occupancy on v7x)."""
    n = b_pad // sub
    if n <= 1:
        return b_pad
    cap = max(1, min(max_tm // sub, (n + 1) // 2))   # >= 2 grid steps
    best = 1
    for d in range(1, cap + 1):
        if n % d == 0:
            best = d
    return best * sub


def mlp_kernel(x_ref, w1_ref, b1_ref, w2_ref, b2_ref, o_ref, *, sub):
    """y = relu(x @ W1 + b1) @ W2 + b2 over one batch tile, in `sub`-row sub-tiles."""
    w1 = w1_ref[...]          # [input_dim, HIDDEN] bf16 (VMEM-resident)
    w2 = w2_ref[...]          # [HIDDEN, N_PAD]     bf16 (VMEM-resident)
    b1 = b1_ref[...]          # [1, HIDDEN] f32 -- natural shape, no big broadcast
    b2 = b2_ref[...]          # [1, N_PAD]  f32
    n_sub = x_ref.shape[0] // sub

    def body(s, carry):
        rows = pl.ds(pl.multiple_of(s * sub, sub), sub)
        x = x_ref[rows, :].astype(jnp.bfloat16)                      # cast in-kernel
        h = jnp.dot(x, w1, preferred_element_type=jnp.float32)       # MXU, f32 acc
        h = jnp.maximum(h + b1, 0.0)                                 # f32 epilogue
        y = jnp.dot(h.astype(jnp.bfloat16), w2,
                    preferred_element_type=jnp.float32)              # MXU, f32 acc
        o_ref[rows, :] = (y + b2).astype(o_ref.dtype)                # lane-dense store
        return carry

    lax.fori_loop(0, n_sub, body, 0, unroll=True)


def simple_transformer_forward(x, w1, b1, w2, b2):
    batch, input_dim = x.shape
    hidden = w1.shape[1]
    num_classes = w2.shape[1]
    out_dtype = x.dtype

    n_pad = _round_up(max(num_classes, LANES), LANES)   # lane-dense output

    if batch >= SUB:
        b_pad = _round_up(batch, SUB)   # pad only to the sub-tile, not the grid tile
        sub = SUB
    else:
        b_pad = _round_up(batch, 16)    # bf16-safe minimum sublane tile
        sub = b_pad
    tm = _pick_tm(b_pad, sub, MAX_TM)

    x_in = x if b_pad == batch else jnp.pad(x, ((0, b_pad - batch), (0, 0)))

    # Weights/biases are tiny and VMEM-resident; one-time cast/pad in the wrapper.
    w1b = w1.astype(jnp.bfloat16)
    w2b = jnp.zeros((hidden, n_pad), jnp.bfloat16)
    w2b = w2b.at[:, :num_classes].set(w2.astype(jnp.bfloat16))
    b1f = b1.astype(jnp.float32).reshape(1, hidden)
    b2f = jnp.zeros((1, n_pad), jnp.float32)
    b2f = b2f.at[:, :num_classes].set(b2.astype(jnp.float32).reshape(1, num_classes))

    out = pl.pallas_call(
        functools.partial(mlp_kernel, sub=sub),
        out_shape=jax.ShapeDtypeStruct((b_pad, n_pad), out_dtype),
        grid_spec=pltpu.PrefetchScalarGridSpec(
            num_scalar_prefetch=0,
            grid=(b_pad // tm,),
            in_specs=[
                pl.BlockSpec((tm, input_dim), lambda i: (i, 0)),     # x: tiled batch
                pl.BlockSpec((input_dim, hidden), lambda i: (0, 0)), # W1: resident
                pl.BlockSpec((1, hidden), lambda i: (0, 0)),         # b1: resident
                pl.BlockSpec((hidden, n_pad), lambda i: (0, 0)),     # W2: resident
                pl.BlockSpec((1, n_pad), lambda i: (0, 0)),          # b2: resident
            ],
            out_specs=pl.BlockSpec((tm, n_pad), lambda i: (i, 0)),
        ),
        compiler_params=pltpu.CompilerParams(
            dimension_semantics=("parallel",),   # shard batch tiles across TCs (v7x)
        ),
    )(x_in, w1b, b1f, w2b, b2f)

    return out[:batch, :num_classes]


def init_params(key, input_dim, hidden, num_classes, dtype=jnp.float32):
    k1, k2, k3, k4 = jax.random.split(key, 4)
    # Deterministic synthetic init (roughly matching nn.Linear's uniform scale).
    s1 = 1.0 / jnp.sqrt(input_dim)
    s2 = 1.0 / jnp.sqrt(hidden)
    w1 = jax.random.uniform(k1, (input_dim, hidden), dtype, -s1, s1)
    b1 = jax.random.uniform(k2, (1, hidden), dtype, -s1, s1)
    w2 = jax.random.uniform(k3, (hidden, num_classes), dtype, -s2, s2)
    b2 = jax.random.uniform(k4, (1, num_classes), dtype, -s2, s2)
    return w1, b1, w2, b2


def _reference_bf16(x, w1, b1, w2, b2):
    # Mirrors the kernel's bf16-operand / f32-accumulate math.
    xb = x.astype(jnp.bfloat16).astype(jnp.float32)
    w1b = w1.astype(jnp.bfloat16).astype(jnp.float32)
    w2b = w2.astype(jnp.bfloat16).astype(jnp.float32)
    h = jnp.maximum(xb @ w1b + b1, 0.0)
    return h.astype(jnp.bfloat16).astype(jnp.float32) @ w2b + b2


if __name__ == "__main__":
    key = jax.random.PRNGKey(0)
    kx, kp, kx2 = jax.random.split(key, 3)

    batch, input_dim, hidden, num_classes = 8, 32, 256, 16
    x = jax.random.normal(kx, (batch, input_dim), jnp.float32)
    w1, b1, w2, b2 = init_params(kp, input_dim, hidden, num_classes)

    fwd = jax.jit(simple_transformer_forward)
    out = jax.block_until_ready(fwd(x, w1, b1, w2, b2))
    assert out.shape == (batch, num_classes)
    assert jnp.allclose(out, _reference_bf16(x, w1, b1, w2, b2), atol=2e-3, rtol=2e-3)
    # Loose check against the full-f32 PyTorch-equivalent math.
    ref_f32 = jnp.maximum(x @ w1 + b1, 0.0) @ w2 + b2
    assert jnp.allclose(out, ref_f32, atol=5e-2, rtol=5e-2)

    # Second shape: exercises the multi-step grid (2 tiles, "parallel" batch axis).
    batch2 = 256
    x2 = jax.random.normal(kx2, (batch2, input_dim), jnp.float32)
    out2 = jax.block_until_ready(fwd(x2, w1, b1, w2, b2))
    assert out2.shape == (batch2, num_classes)
    assert jnp.allclose(out2, _reference_bf16(x2, w1, b1, w2, b2), atol=2e-3, rtol=2e-3)

    print("KERNEL_OK")
</pallas_src>

<mosaic_0001>
module attributes {stable_mosaic.version = 11 : i64} {
  func.func @mlp_kernel(%arg0: i32, %arg1: memref<16x32xf32, #tpu.memory_space<vmem>>, %arg2: memref<32x256xbf16, #tpu.memory_space<vmem>>, %arg3: memref<1x256xf32, #tpu.memory_space<vmem>>, %arg4: memref<256x128xbf16, #tpu.memory_space<vmem>>, %arg5: memref<1x128xf32, #tpu.memory_space<vmem>>, %arg6: memref<16x128xf32, #tpu.memory_space<vmem>>) attributes {dimension_semantics = [#tpu.dimension_semantics<parallel>], iteration_bounds = array<i64: 1>, scalar_prefetch = 0 : i64, scratch_operands = 0 : i64, tpu.core_type = #tpu.core_type<tc>, window_params = [{transform_indices = @transform_0, window_bounds = array<i64: 16, 32>}, {pipeline_mode = #tpu.pipeline_mode<synchronous>, transform_indices = @transform_1, window_bounds = array<i64: 32, 256>}, {pipeline_mode = #tpu.pipeline_mode<synchronous>, transform_indices = @transform_2, window_bounds = array<i64: 1, 256>}, {pipeline_mode = #tpu.pipeline_mode<synchronous>, transform_indices = @transform_3, window_bounds = array<i64: 256, 128>}, {pipeline_mode = #tpu.pipeline_mode<synchronous>, transform_indices = @transform_4, window_bounds = array<i64: 1, 128>}, {transform_indices = @transform_5, window_bounds = array<i64: 16, 128>}]} {
    %c0 = arith.constant 0 : index
    %c0_0 = arith.constant 0 : index
    %0 = vector.load %arg2[%c0, %c0_0] : memref<32x256xbf16, #tpu.memory_space<vmem>>, vector<32x256xbf16>
    %c0_1 = arith.constant 0 : index
    %c0_2 = arith.constant 0 : index
    %1 = vector.load %arg4[%c0_1, %c0_2] : memref<256x128xbf16, #tpu.memory_space<vmem>>, vector<256x128xbf16>
    %c0_3 = arith.constant 0 : index
    %c0_4 = arith.constant 0 : index
    %2 = vector.load %arg3[%c0_3, %c0_4] : memref<1x256xf32, #tpu.memory_space<vmem>>, vector<1x256xf32>
    %c0_5 = arith.constant 0 : index
    %c0_6 = arith.constant 0 : index
    %3 = vector.load %arg5[%c0_5, %c0_6] : memref<1x128xf32, #tpu.memory_space<vmem>>, vector<1x128xf32>
    %c0_i32 = arith.constant 0 : i32
    %c16_i32 = arith.constant 16 : i32
    %4 = arith.muli %c0_i32, %c16_i32 : i32
    %5 = tpu.assume_multiple %4, 16 : i32
    %6 = arith.index_cast %5 : i32 to index
    %c0_7 = arith.constant 0 : index
    %7 = vector.load %arg1[%6, %c0_7] : memref<16x32xf32, #tpu.memory_space<vmem>>, vector<16x32xf32>
    %8 = arith.truncf %7 : vector<16x32xf32> to vector<16x32xbf16>
    %cst = arith.constant dense<0.000000e+00> : vector<16x256xf32>
    %9 = tpu.matmul %8, %0, %cst {dimension_numbers = #tpu.dot_dimension_numbers<[1], [0], [0], [1], [0, 0, 1, 1], [], []>} : vector<16x32xbf16>, vector<32x256xbf16>, vector<16x256xf32> -> vector<16x256xf32>
    %10 = vector.broadcast %2 : vector<1x256xf32> to vector<16x256xf32>
    %11 = arith.addf %9, %10 : vector<16x256xf32>
    %cst_8 = arith.constant 0.000000e+00 : f32
    %12 = vector.broadcast %cst_8 : f32 to vector<16x256xf32>
    %13 = arith.maximumf %11, %12 : vector<16x256xf32>
    %14 = arith.truncf %13 : vector<16x256xf32> to vector<16x256xbf16>
    %cst_9 = arith.constant dense<0.000000e+00> : vector<16x128xf32>
    %15 = tpu.matmul %14, %1, %cst_9 {dimension_numbers = #tpu.dot_dimension_numbers<[1], [0], [0], [1], [0, 0, 1, 1], [], []>} : vector<16x256xbf16>, vector<256x128xbf16>, vector<16x128xf32> -> vector<16x128xf32>
    %16 = vector.broadcast %3 : vector<1x128xf32> to vector<16x128xf32>
    %17 = arith.addf %15, %16 : vector<16x128xf32>
    %18 = arith.index_cast %5 : i32 to index
    %c0_10 = arith.constant 0 : index
    %19 = vector.load %arg6[%18, %c0_10] : memref<16x128xf32, #tpu.memory_space<vmem>>, vector<16x128xf32>
    tpu.vector_store %arg6[%18, %c0_10], %17 {strides = array<i32>} : memref<16x128xf32, #tpu.memory_space<vmem>>, vector<16x128xf32>,
    %c1_i32 = arith.constant 1 : i32
    return
  }
  func.func @transform_0(%arg0: i32) -> (i32, i32) {
    %c0_i32 = arith.constant 0 : i32
    %c0_i32_0 = arith.constant 0 : i32
    return %arg0, %c0_i32 : i32, i32
  }
  func.func @transform_1(%arg0: i32) -> (i32, i32) {
    %c0_i32 = arith.constant 0 : i32
    %c0_i32_0 = arith.constant 0 : i32
    %c0_i32_1 = arith.constant 0 : i32
    return %c0_i32, %c0_i32_0 : i32, i32
  }
  func.func @transform_2(%arg0: i32) -> (i32, i32) {
    %c0_i32 = arith.constant 0 : i32
    %c0_i32_0 = arith.constant 0 : i32
    %c0_i32_1 = arith.constant 0 : i32
    return %c0_i32, %c0_i32_0 : i32, i32
  }
  func.func @transform_3(%arg0: i32) -> (i32, i32) {
    %c0_i32 = arith.constant 0 : i32
    %c0_i32_0 = arith.constant 0 : i32
    %c0_i32_1 = arith.constant 0 : i32
    return %c0_i32, %c0_i32_0 : i32, i32
  }
  func.func @transform_4(%arg0: i32) -> (i32, i32) {
    %c0_i32 = arith.constant 0 : i32
    %c0_i32_0 = arith.constant 0 : i32
    %c0_i32_1 = arith.constant 0 : i32
    return %c0_i32, %c0_i32_0 : i32, i32
  }
  func.func @transform_5(%arg0: i32) -> (i32, i32) {
    %c0_i32 = arith.constant 0 : i32
    %c0_i32_0 = arith.constant 0 : i32
    return %arg0, %c0_i32 : i32, i32
  }
}

</mosaic_0001>

<bundles_post_ra>
// kernel: simple_transformer_forward.1
= control target key start
LH: loop header
LB: loop body
LE: loop exit
PB: predicated region body
PF: predicated region fallthrough
CT: control target
= control target key end

     0   :  { %v362_v1 = vmov 0   ;;  %vm93_vm0 = vcmask 261120   ;;  %v63_v24 = vlaneseq  ;;  %s471_s1 = inlined_call_operand.vmem [shape: bf16[32,256], index: 1, kind: input, shape index: {}]   ;;  %s472_s0 = inlined_call_operand.vmem [shape: f32[16,32], index: 0, kind: input, shape index: {}]   ;;  %s473_s3 = inlined_call_operand.vmem [shape: bf16[256,128], index: 3, kind: input, shape index: {}]   ;;  %s474_s2 = inlined_call_operand.vmem [shape: f32[1,256], index: 2, kind: input, shape index: {}]   ;;  %s475_s4 = inlined_call_operand.vmem [shape: f32[1,128], index: 4, kind: input, shape index: {}]   ;;  %s476_s5 = inlined_call_operand.vmem [shape: f32[16,128], index: 5, kind: output, shape index: {}]  }
   0x1   :  { %v340_v0 = vld [vmem:[%s471_s1 + $0x14] ss:$8 sps:$4 sm:$0xff]   ;;  %129 = vmatprep.mubr.bf16.mxu0 %v362_v1  ;;  %v342_v2 = vld [vmem:[%s471_s1 + $0x10] ss:$8 sps:$4 sm:$0xff]   ;;  %v343_v3 = vld [vmem:[%s471_s1 + $0x4] ss:$8 sps:$4 sm:$0xff]  }
   0x2   :  { %109 = vmatprep.subr.bf16.mxu0 %v340_v0  ;;  %v345_v4 = vld [vmem:[%s471_s1] ss:$8 sps:$4 sm:$0xff]   ;;  %v346_v7 = vld [vmem:[%s473_s3 + $0x78] sm:$0xff]   ;;  %v348_v10 = vld [vmem:[%s473_s3 + $0x70] sm:$0xff]   ;;  %v64_v25 = vshrl.u32 %v63_v24, 7 }
   0x3   :  { %v59_v5 = vld [vmem:[%s472_s0] sm:$0xff]  ;;  %110 = vmatpush1.bf16.msra.mxu0 %v342_v2  ;;  %v60_v6 = vld [vmem:[%s472_s0 + $0x8] sm:$0xff]  ;;  %v347_v8 = vld [vmem:[%s473_s3 + $0x38] sm:$0xff]   ;;  %317 = vmatprep.subr.bf16.mxu1 %v346_v7 }
   0x4   :  { %111 = vmatprep.subr.bf16.mxu0 %v343_v3  ;;  %v61_v9 = vpack.c.bf16 %v60_v6, %v59_v5  ;;  %318 = vmatpush3.bf16.msra.mxu1 %v347_v8  ;;  %v349_v11 = vld [vmem:[%s473_s3 + $0x30] sm:$0xff]   ;;  %v350_v12 = vld [vmem:[%s473_s3 + $0x68] sm:$0xff]   ;;  %v352_v14 = vld [vmem:[%s473_s3 + $0x60] sm:$0xff]   ;;  %v69_v26 = vsub.s32 1, %v64_v25  ;;  %v65_v27 = vsub.s32 0, %v64_v25 }
   0x5   :  { %319 = vmatprep.subr.bf16.mxu1 %v348_v10  ;;  %v351_v13 = vld [vmem:[%s473_s3 + $0x28] sm:$0xff]   ;;  %v353_v15 = vld [vmem:[%s473_s3 + $0x20] sm:$0xff]   ;;  %v354_v16 = vld [vmem:[%s473_s3 + $0x58] sm:$0xff]  }
   0x6   :  { %v355_v17 = vld [vmem:[%s473_s3 + $0x18] sm:$0xff]   ;;  %v356_v18 = vld [vmem:[%s473_s3 + $0x50] sm:$0xff]   ;;  %v358_v20 = vld [vmem:[%s473_s3 + $0x48] sm:$0xff]  }
   0x7   :  { %112 = vmatpush1.bf16.msra.mxu0 %v345_v4  ;;  %v357_v19 = vld [vmem:[%s473_s3 + $0x10] sm:$0xff]   ;;  %v359_v21 = vld [vmem:[%s473_s3 + $0x8] sm:$0xff]   ;;  %v360_v22 = vld [vmem:[%s473_s3 + $0x40] sm:$0xff]  }
   0x8   :  { %320 = vmatpush3.bf16.msra.mxu1 %v349_v11  ;;  %v361_v23 = vld [vmem:[%s473_s3] sm:$0xff]  }
   0x9   :  { %321 = vmatprep.subr.bf16.mxu1 %v350_v12  ;;  %v57_v28 = vld [vmem:[%s474_s2] sm:$0x3] }
   0xa   :  { %299 = vmatmul.mubr.msk.bf16.vlgmr.msra.gmra.mxu0 %vm93_vm0, %v61_v9  ;;  %v70_v30 = vrot.slane %v57_v28, %v69_v26  ;;  %v66_v31 = vrot.slane %v57_v28, %v65_v27  ;;  %v300_v46 = vld [vmem:[%s475_s4] ss:$0 sm:$0xff] }
   0xc   :  { %322 = vmatpush3.bf16.msra.mxu1 %v351_v13 }
   0xd   :  { %323 = vmatprep.subr.bf16.mxu1 %v352_v14 }
  0x10   :  { %324 = vmatpush3.bf16.msra.mxu1 %v353_v15 }
  0x11   :  { %325 = vmatprep.subr.bf16.mxu1 %v354_v16 }
  0x14   :  { %326 = vmatpush3.bf16.msra.mxu1 %v355_v17 }
  0x15   :  { %327 = vmatprep.subr.bf16.mxu1 %v356_v18 }
  0x18   :  { %328 = vmatpush3.bf16.msra.mxu1 %v357_v19 }
  0x19   :  { %329 = vmatprep.subr.bf16.mxu1 %v358_v20 }
  0x1c   :  { %330 = vmatpush3.bf16.msra.mxu1 %v359_v21 }
  0x1d   :  { %331 = vmatprep.subr.bf16.mxu1 %v360_v22 }
  0x20   :  { %332 = vmatpush3.bf16.msra.mxu1 %v361_v23 }
  0xca   :  { %v131_v29 = vpop.f32.mrf.mxu0 }
  0xcb   :  { %v132_v36 = vadd.f32 %v131_v29, %v66_v31 }
  0xcc   :  { %v133_v32 = vpop.f32.mrf.mxu0 }
  0xcd   :  { %v134_v34 = vadd.f32 %v133_v32, %v70_v30  ;;  %v140_v42 = vmax.f32 %v132_v36, 0.0 }
  0xce   :  { %v135_v33 = vpop.f32.mrf.mxu0 }
  0xcf   :  { %v136_v35 = vadd.f32 %v135_v33, %v66_v31  ;;  %v141_v40 = vmax.f32 %v134_v34, 0.0 }
  0xd0   :  { %v137_v37 = vpop.f32.mrf.mxu0 }
  0xd1   :  { %v138_v38 = vadd.f32 %v137_v37, %v70_v30  ;;  %v142_v39 = vmax.f32 %v136_v35, 0.0 }
  0xd3   :  { %v143_v41 = vmax.f32 %v138_v38, 0.0  ;;  %v144_v44 = vpack.c.bf16 %v142_v39, %v140_v42 }
  0xd5   :  { %v145_v43 = vpack.c.bf16 %v143_v41, %v141_v40 }
  0xd7   :  { %280 = vmatprep.mubr.bf16.mxu1 %v145_v43 }
  0xd8   :  { %281 = vmatmul.mubr.bf16.vlgmr.msra.gmra.mxu1 %v144_v44 }
 0x198   :  { %v333_v45 = vpop.f32.mrf.mxu1 }
 0x19a   :  { %v334_v47 = vpop.f32.mrf.mxu1 }
 0x19b   :  { %v335_v48 = vadd.f32 %v334_v47, %v333_v45 }
 0x19c   :  { %v336_v49 = vpop.f32.mrf.mxu1 }
 0x19d   :  { %v283_v50 = vadd.f32 %v335_v48, %v300_v46 }
 0x19e   :  { %v337_v51 = vpop.f32.mrf.mxu1 }
 0x19f   :  { %289 = vst [vmem:[%s476_s5] sm:$0xff] %v283_v50  ;;  %v338_v52 = vadd.f32 %v337_v51, %v336_v49 }
 0x1a1   :  { %v286_v53 = vadd.f32 %v338_v52, %v300_v46 }
 0x1a3   :  { %290 = vst [vmem:[%s476_s5 + $0x8] sm:$0xff] %v286_v53 }

</bundles_post_ra>
